<compile_context>
chip_gen: v7x
topology: tpu7x:2x2x1
jax: 0.10.0
libtpu: 0.0.40
codegen_flags: <defaults>
</compile_context>

<pallas_src>
import math
import functools

import jax
import jax.numpy as jnp
from jax import lax
from jax.experimental import pallas as pl
from jax.experimental.pallas import tpu as pltpu


# Tile targets.
_TM, _TN, _TK = 512, 512, 512      # linear tiles
_TQ_ATTN = 128                     # attention query tile (bounds the
                                   # (1, H, tq, Sk) weights block in VMEM)
_VMEM_LIMIT = 48 * 1024 * 1024     # leaves headroom on v7x (64 MiB physical)


def _tile(dim, target, align):
    """Largest multiple of `align` that divides `dim` and is <= target.

    Falls back to the full dim (always a legal block) when no aligned divisor
    exists, so odd shapes stay correct instead of violating the (8,128) rule.
    """
    t = min(dim, target)
    t -= t % align
    while t >= align:
        if dim % t == 0:
            return t
        t -= align
    return dim


def _itemsize(dt):
    return jnp.dtype(dt).itemsize


# ----------------------------- Pallas kernels ------------------------------ #

def _linear_kernel(x_ref, w_ref, b_ref, o_ref, acc_ref):
    # x: (tm, tk), w: (tk, tn), b: (1, tn) -> o: (tm, tn); K axis = grid dim 2.
    @pl.when(pl.program_id(2) == 0)
    def _init():
        acc_ref[...] = jnp.zeros_like(acc_ref)

    # Operands already arrive in the compute dtype (bf16 casts happen once in
    # HBM, not per tile); accumulation is always f32.
    acc_ref[...] += jnp.dot(x_ref[...], w_ref[...],
                            preferred_element_type=jnp.float32)

    @pl.when(pl.program_id(2) == pl.num_programs(2) - 1)
    def _finalize():
        o_ref[...] = (acc_ref[...] + b_ref[...].astype(jnp.float32)
                      ).astype(o_ref.dtype)


def _attention_kernel(q_ref, k_ref, v_ref, m_ref, o_ref, a_ref,
                      *, num_heads, depth, scale):
    # q: (1, tq, d_model)  k/v: (1, Sk, d_model)  m: (1, 1, Sk)
    # o: (1, tq, d_model)  a: (1, H, tq, Sk)
    neg = m_ref[0].astype(jnp.float32) * (-1.0e9)     # (1, Sk), broadcast rows
    dn = (((1,), (1,)), ((), ()))                     # contract last dims (no k.T)

    for h in range(num_heads):                        # static unroll over heads
        sl = slice(h * depth, (h + 1) * depth)        # static lane slice
        q_h = q_ref[0, :, sl] * scale                 # fold 1/sqrt(depth) into q
        k_h = k_ref[0, :, sl]
        v_h = v_ref[0, :, sl]

        s = lax.dot_general(q_h, k_h, dn,
                            preferred_element_type=jnp.float32)   # (tq, Sk)
        s = s + neg
        s = s - jnp.max(s, axis=-1, keepdims=True)    # stabilized softmax
        e = jnp.exp(s)
        p = e / jnp.sum(e, axis=-1, keepdims=True)    # exact normalization

        a_ref[0, h] = p.astype(a_ref.dtype)
        ctx = jnp.dot(p.astype(v_h.dtype), v_h,
                      preferred_element_type=jnp.float32)          # (tq, depth)
        # per-head store: bounds live ranges, no list/concat temporaries
        o_ref[0, :, sl] = ctx.astype(o_ref.dtype)


# ------------------------------ Pallas wrappers ----------------------------- #

def pallas_linear(x2d, w, b, *, out_dtype=None):
    """x2d: (M, K), w: (K, N), b: (N,) -> (M, N); tiled, pipelined, f32 acc."""
    M, K = x2d.shape
    Kw, N = w.shape
    assert K == Kw
    out_dtype = x2d.dtype if out_dtype is None else out_dtype
    tm = _tile(M, _TM, 8)
    tn = _tile(N, _TN, 128)
    tk = _tile(K, _TK, 128)

    cost = pl.CostEstimate(
        flops=2 * M * N * K,
        transcendentals=0,
        bytes_accessed=(M * K * _itemsize(x2d.dtype)
                        + K * N * _itemsize(w.dtype)
                        + N * _itemsize(b.dtype)
                        + M * N * _itemsize(out_dtype)),
    )
    return pl.pallas_call(
        _linear_kernel,
        out_shape=jax.ShapeDtypeStruct((M, N), out_dtype),
        grid=(M // tm, N // tn, K // tk),
        in_specs=[
            pl.BlockSpec((tm, tk), lambda i, j, k: (i, k)),
            pl.BlockSpec((tk, tn), lambda i, j, k: (k, j)),
            pl.BlockSpec((1, tn), lambda i, j, k: (0, j)),
        ],
        out_specs=pl.BlockSpec((tm, tn), lambda i, j, k: (i, j)),
        scratch_shapes=[pltpu.VMEM((tm, tn), jnp.float32)],
        compiler_params=pltpu.CompilerParams(
            dimension_semantics=("parallel", "parallel", "arbitrary"),
            vmem_limit_bytes=_VMEM_LIMIT,
        ),
        cost_estimate=cost,
    )(x2d, w, b.reshape(1, N))


def pallas_attention(q_arr, k_arr, v_arr, mask_row, *, num_heads, d_model,
                     qkv_offsets=(0, 0, 0), out_dtype=None,
                     weights_dtype=jnp.float32):
    """Scaled dot-product attention over packed-heads layout.

    q_arr: (B, Sq, C), k_arr/v_arr: (B, Sk, C) where the d_model-wide q/k/v
    slabs start at lane-block offset qkv_offsets[i] (so a fused (B, Sq,
    3*d_model) QKV tensor can be consumed without materializing slices in HBM).
    mask_row: (B, 1, Sk) key-padding row (1.0 = suppress).
    Returns (context (B, Sq, d_model), weights (B, H, Sq, Sk)).
    """
    B, Sq = q_arr.shape[:2]
    Sk = k_arr.shape[1]
    depth = d_model // num_heads
    tq = _tile(Sq, _TQ_ATTN, 8)
    out_dtype = q_arr.dtype if out_dtype is None else out_dtype
    scale = 1.0 / math.sqrt(depth)
    qo, ko, vo = qkv_offsets

    kernel = functools.partial(_attention_kernel, num_heads=num_heads,
                               depth=depth, scale=scale)
    cost = pl.CostEstimate(
        flops=4 * B * Sq * Sk * d_model,
        transcendentals=B * num_heads * Sq * Sk,
        bytes_accessed=((B * Sq * d_model + 2 * B * Sk * d_model)
                        * _itemsize(q_arr.dtype)
                        + B * Sk * _itemsize(mask_row.dtype)
                        + B * Sq * d_model * _itemsize(out_dtype)
                        + B * num_heads * Sq * Sk * _itemsize(weights_dtype)),
    )
    out, attn = pl.pallas_call(
        kernel,
        out_shape=(
            jax.ShapeDtypeStruct((B, Sq, d_model), out_dtype),
            jax.ShapeDtypeStruct((B, num_heads, Sq, Sk), weights_dtype),
        ),
        grid=(B, Sq // tq),
        in_specs=[
            pl.BlockSpec((1, tq, d_model), lambda b, qi, qo=qo: (b, qi, qo)),
            pl.BlockSpec((1, Sk, d_model), lambda b, qi, ko=ko: (b, 0, ko)),
            pl.BlockSpec((1, Sk, d_model), lambda b, qi, vo=vo: (b, 0, vo)),
            pl.BlockSpec((1, 1, Sk), lambda b, qi: (b, 0, 0)),
        ],
        out_specs=(
            pl.BlockSpec((1, tq, d_model), lambda b, qi: (b, qi, 0)),
            pl.BlockSpec((1, num_heads, tq, Sk), lambda b, qi: (b, 0, qi, 0)),
        ),
        compiler_params=pltpu.CompilerParams(
            dimension_semantics=("parallel", "parallel"),
            vmem_limit_bytes=_VMEM_LIMIT,
        ),
        cost_estimate=cost,
    )(q_arr, k_arr, v_arr, mask_row)
    return out, attn


# ------------------------------ Module forward ------------------------------ #

def multi_head_attention(q, k, v, mask, params, num_heads,
                         *, compute_dtype=None, weights_dtype=jnp.float32):
    """Mirrors MultiHeadAttention.forward; returns (output, attention_weights).

    params holds (in_features, out_features) weights.  Optional pre-fused
    "wqkv_w"/"wqkv_b" hoist the QKV concat out of the forward.  Pass
    compute_dtype=jnp.bfloat16 (with params pre-cast to bf16) for MXU-peak
    operands; accumulation is always f32.
    """
    B, Sq, d_model = q.shape
    Sk = k.shape[1]
    assert d_model % num_heads == 0
    out_dtype = q.dtype
    cdt = q.dtype if compute_dtype is None else compute_dtype

    def cast(t):
        return t if t.dtype == jnp.dtype(cdt) else t.astype(cdt)

    self_attn = (q is k) and (k is v)
    if self_attn:
        # Fused QKV projection: one wide matmul, x read once.
        if "wqkv_w" in params:
            w_qkv, b_qkv = params["wqkv_w"], params["wqkv_b"]
        else:
            # TODO(synk): pre-fuse at init time to avoid this per-call concat.
            w_qkv = jnp.concatenate(
                [params["wq_w"], params["wk_w"], params["wv_w"]], axis=1)
            b_qkv = jnp.concatenate(
                [params["wq_b"], params["wk_b"], params["wv_b"]], axis=0)
        qkv = pallas_linear(cast(q).reshape(B * Sq, d_model), cast(w_qkv),
                            b_qkv, out_dtype=cdt).reshape(B, Sq, 3 * d_model)
        if d_model % 128 == 0:
            # Attention BlockSpecs index straight into the packed tensor
            # (lane-block offsets 0/1/2): no slice copies round-trip HBM.
            qp = kp = vp = qkv
            offsets = (0, 1, 2)
        else:
            qp = qkv[..., :d_model]
            kp = qkv[..., d_model:2 * d_model]
            vp = qkv[..., 2 * d_model:]
            offsets = (0, 0, 0)
    else:
        qp = pallas_linear(cast(q).reshape(B * Sq, d_model), cast(params["wq_w"]),
                           params["wq_b"], out_dtype=cdt).reshape(B, Sq, d_model)
        kp = pallas_linear(cast(k).reshape(B * Sk, d_model), cast(params["wk_w"]),
                           params["wk_b"], out_dtype=cdt).reshape(B, Sk, d_model)
        vp = pallas_linear(cast(v).reshape(B * Sk, d_model), cast(params["wv_w"]),
                           params["wv_b"], out_dtype=cdt).reshape(B, Sk, d_model)
        offsets = (0, 0, 0)

    # key-padding mask -> single (B, 1, Sk) row; the head/row broadcast happens
    # in-kernel, so no (B, H, Sq, Sk) mask is ever materialized in HBM.
    if mask is None:
        mask_row = jnp.zeros((B, 1, Sk), jnp.float32)
    else:
        assert mask.shape == (B, 1, 1, Sk), "kernel expects a key-padding mask"
        # TODO(synk): general (B, H, Sq, Sk) additive masks would need their own
        # per-head BlockSpec stream.
        mask_row = mask.reshape(B, 1, Sk).astype(jnp.float32)

    # heads stay packed in (B, S, d_model): no split/merge transposes in HBM
    ctx, attention_weights = pallas_attention(
        qp, kp, vp, mask_row, num_heads=num_heads, d_model=d_model,
        qkv_offsets=offsets, out_dtype=cdt, weights_dtype=weights_dtype)

    # TODO(synk): for short Sk this dense projection could be fused into the
    # attention finalize (dense_w resident in VMEM) to save one (B, Sq, d_model)
    # HBM round-trip.
    output = pallas_linear(ctx.reshape(B * Sq, d_model), cast(params["dense_w"]),
                           params["dense_b"], out_dtype=out_dtype
                           ).reshape(B, Sq, d_model)
    return output, attention_weights


# ------------------------------ Pure-JAX reference --------------------------- #

def reference(q, k, v, mask, params, num_heads):
    B, Sq, d_model = q.shape
    Sk = k.shape[1]
    depth = d_model // num_heads
    qp = q @ params["wq_w"] + params["wq_b"]
    kp = k @ params["wk_w"] + params["wk_b"]
    vp = v @ params["wv_w"] + params["wv_b"]
    qh = qp.reshape(B, Sq, num_heads, depth).transpose(0, 2, 1, 3)
    kh = kp.reshape(B, Sk, num_heads, depth).transpose(0, 2, 1, 3)
    vh = vp.reshape(B, Sk, num_heads, depth).transpose(0, 2, 1, 3)
    scores = jnp.einsum("bhqd,bhkd->bhqk", qh, kh) / math.sqrt(depth)
    if mask is not None:
        scores = scores + mask * (-1.0e9)
    attn = jax.nn.softmax(scores, axis=-1)
    out = jnp.einsum("bhqk,bhkd->bhqd", attn, vh)
    out = out.transpose(0, 2, 1, 3).reshape(B, Sq, d_model)
    output = out @ params["dense_w"] + params["dense_b"]
    return output, attn


# ----------------------------------- Main ----------------------------------- #

if __name__ == "__main__":
    B, S, d_model, num_heads = 2, 8, 128, 4

    key = jax.random.PRNGKey(0)
    keys = jax.random.split(key, 16)

    wscale = 1.0 / math.sqrt(d_model)
    params = {
        "wq_w": jax.random.normal(keys[0], (d_model, d_model), jnp.float32) * wscale,
        "wq_b": jax.random.normal(keys[1], (d_model,), jnp.float32) * 0.01,
        "wk_w": jax.random.normal(keys[2], (d_model, d_model), jnp.float32) * wscale,
        "wk_b": jax.random.normal(keys[3], (d_model,), jnp.float32) * 0.01,
        "wv_w": jax.random.normal(keys[4], (d_model, d_model), jnp.float32) * wscale,
        "wv_b": jax.random.normal(keys[5], (d_model,), jnp.float32) * 0.01,
        "dense_w": jax.random.normal(keys[6], (d_model, d_model), jnp.float32) * wscale,
        "dense_b": jax.random.normal(keys[7], (d_model,), jnp.float32) * 0.01,
    }
    # Hoist the fused-QKV weight concatenation out of the forward (done once).
    params["wqkv_w"] = jnp.concatenate(
        [params["wq_w"], params["wk_w"], params["wv_w"]], axis=1)
    params["wqkv_b"] = jnp.concatenate(
        [params["wq_b"], params["wk_b"], params["wv_b"]], axis=0)

    x = jax.random.normal(keys[8], (B, S, d_model), jnp.float32)
    # mask: 1.0 marks key positions to suppress; broadcastable to (B, H, Sq, Sk)
    mask = (jax.random.uniform(keys[9], (B, 1, 1, S)) > 0.7).astype(jnp.float32)

    # --- 1) self-attention (q = k = v): fused-QKV + packed BlockSpec path ----
    out, attn = multi_head_attention(x, x, x, mask, params, num_heads)
    out, attn = jax.block_until_ready((out, attn))
    ref_out, ref_attn = reference(x, x, x, mask, params, num_heads)
    assert out.shape == (B, S, d_model) and attn.shape == (B, num_heads, S, S)
    assert jnp.allclose(out, ref_out, atol=2e-3, rtol=2e-3)
    assert jnp.allclose(attn, ref_attn, atol=2e-3, rtol=2e-3)

    # --- 2) cross-attention (distinct q/k/v, no mask): separate projections --
    q2 = jax.random.normal(keys[10], (B, S, d_model), jnp.float32)
    k2 = jax.random.normal(keys[11], (B, S, d_model), jnp.float32)
    v2 = jax.random.normal(keys[12], (B, S, d_model), jnp.float32)
    out2, attn2 = multi_head_attention(q2, k2, v2, None, params, num_heads)
    out2, attn2 = jax.block_until_ready((out2, attn2))
    ref_out2, ref_attn2 = reference(q2, k2, v2, None, params, num_heads)
    assert jnp.allclose(out2, ref_out2, atol=2e-3, rtol=2e-3)
    assert jnp.allclose(attn2, ref_attn2, atol=2e-3, rtol=2e-3)

    # --- 3) bf16 operands stored in HBM (f32 accumulation), bf16 weights -----
    params_bf16 = {name: (val.astype(jnp.bfloat16) if name.endswith("_w") else val)
                   for name, val in params.items()}
    out3, attn3 = multi_head_attention(x, x, x, mask, params_bf16, num_heads,
                                       compute_dtype=jnp.bfloat16,
                                       weights_dtype=jnp.bfloat16)
    out3, attn3 = jax.block_until_ready((out3, attn3))
    assert jnp.allclose(out3, ref_out, atol=2e-1, rtol=2e-1)
    assert jnp.allclose(attn3.astype(jnp.float32), ref_attn, atol=2e-1, rtol=2e-1)

    print("KERNEL_OK")
</pallas_src>

<mosaic_0001>
module attributes {stable_mosaic.version = 11 : i64} {
  func.func @_linear_kernel(%arg0: i32, %arg1: i32, %arg2: i32, %arg3: memref<16x128xf32, #tpu.memory_space<vmem>>, %arg4: memref<128x384xf32, #tpu.memory_space<vmem>>, %arg5: memref<1x384xf32, #tpu.memory_space<vmem>>, %arg6: memref<16x384xf32, #tpu.memory_space<vmem>>, %arg7: memref<16x384xf32, #tpu.memory_space<vmem>>) attributes {dimension_semantics = [#tpu.dimension_semantics<parallel>, #tpu.dimension_semantics<parallel>, #tpu.dimension_semantics<arbitrary>], iteration_bounds = array<i64: 1, 1, 1>, scalar_prefetch = 0 : i64, scratch_operands = 1 : i64, tpu.core_type = #tpu.core_type<tc>, window_params = [{transform_indices = @transform_0, window_bounds = array<i64: 16, 128>}, {transform_indices = @transform_1, window_bounds = array<i64: 128, 384>}, {transform_indices = @transform_2, window_bounds = array<i64: 1, 384>}, {transform_indices = @transform_3, window_bounds = array<i64: 16, 384>}]} {
    %c0_i32 = arith.constant 0 : i32
    %0 = arith.cmpi eq, %arg2, %c0_i32 : i32
    %1 = arith.extui %0 : i1 to i32
    %c0_i32_0 = arith.constant 0 : i32
    %2 = arith.cmpi ne, %1, %c0_i32_0 : i32
    scf.if %2 {
      %cst_10 = arith.constant 0.000000e+00 : f32
      %12 = vector.broadcast %cst_10 : f32 to vector<16x384xf32>
      %c0_11 = arith.constant 0 : index
      %c0_12 = arith.constant 0 : index
      %13 = vector.load %arg7[%c0_11, %c0_12] : memref<16x384xf32, #tpu.memory_space<vmem>>, vector<16x384xf32>
      tpu.vector_store %arg7[%c0_11, %c0_12], %12 {strides = array<i32>} : memref<16x384xf32, #tpu.memory_space<vmem>>, vector<16x384xf32>,
    } else {
    }
    %c0 = arith.constant 0 : index
    %c0_1 = arith.constant 0 : index
    %3 = vector.load %arg7[%c0, %c0_1] : memref<16x384xf32, #tpu.memory_space<vmem>>, vector<16x384xf32>
    %c0_2 = arith.constant 0 : index
    %c0_3 = arith.constant 0 : index
    %4 = vector.load %arg3[%c0_2, %c0_3] : memref<16x128xf32, #tpu.memory_space<vmem>>, vector<16x128xf32>
    %c0_4 = arith.constant 0 : index
    %c0_5 = arith.constant 0 : index
    %5 = vector.load %arg4[%c0_4, %c0_5] : memref<128x384xf32, #tpu.memory_space<vmem>>, vector<128x384xf32>
    %cst = arith.constant dense<0.000000e+00> : vector<16x384xf32>
    %6 = tpu.matmul %4, %5, %cst {dimension_numbers = #tpu.dot_dimension_numbers<[1], [0], [0], [1], [0, 0, 1, 1], [], []>} : vector<16x128xf32>, vector<128x384xf32>, vector<16x384xf32> -> vector<16x384xf32>
    %7 = arith.addf %3, %6 : vector<16x384xf32>
    %c0_6 = arith.constant 0 : index
    %c0_7 = arith.constant 0 : index
    %8 = vector.load %arg7[%c0_6, %c0_7] : memref<16x384xf32, #tpu.memory_space<vmem>>, vector<16x384xf32>
    tpu.vector_store %arg7[%c0_6, %c0_7], %7 {strides = array<i32>} : memref<16x384xf32, #tpu.memory_space<vmem>>, vector<16x384xf32>,
    %c0_i32_8 = arith.constant 0 : i32
    %9 = arith.cmpi eq, %arg2, %c0_i32_8 : i32
    %10 = arith.extui %9 : i1 to i32
    %c0_i32_9 = arith.constant 0 : i32
    %11 = arith.cmpi ne, %10, %c0_i32_9 : i32
    scf.if %11 {
      %c0_10 = arith.constant 0 : index
      %c0_11 = arith.constant 0 : index
      %12 = vector.load %arg7[%c0_10, %c0_11] : memref<16x384xf32, #tpu.memory_space<vmem>>, vector<16x384xf32>
      %c0_12 = arith.constant 0 : index
      %c0_13 = arith.constant 0 : index
      %13 = vector.load %arg5[%c0_12, %c0_13] : memref<1x384xf32, #tpu.memory_space<vmem>>, vector<1x384xf32>
      %14 = vector.broadcast %13 : vector<1x384xf32> to vector<16x384xf32>
      %15 = arith.addf %12, %14 : vector<16x384xf32>
      %c0_14 = arith.constant 0 : index
      %c0_15 = arith.constant 0 : index
      %16 = vector.load %arg6[%c0_14, %c0_15] : memref<16x384xf32, #tpu.memory_space<vmem>>, vector<16x384xf32>
      tpu.vector_store %arg6[%c0_14, %c0_15], %15 {strides = array<i32>} : memref<16x384xf32, #tpu.memory_space<vmem>>, vector<16x384xf32>,
    } else {
    }
    return
  }
  func.func @transform_0(%arg0: i32, %arg1: i32, %arg2: i32) -> (i32, i32) {
    %c0_i32 = arith.constant 0 : i32
    return %arg0, %arg2 : i32, i32
  }
  func.func @transform_1(%arg0: i32, %arg1: i32, %arg2: i32) -> (i32, i32) {
    %c0_i32 = arith.constant 0 : i32
    return %arg2, %arg1 : i32, i32
  }
  func.func @transform_2(%arg0: i32, %arg1: i32, %arg2: i32) -> (i32, i32) {
    %c0_i32 = arith.constant 0 : i32
    %c0_i32_0 = arith.constant 0 : i32
    return %c0_i32, %arg1 : i32, i32
  }
  func.func @transform_3(%arg0: i32, %arg1: i32, %arg2: i32) -> (i32, i32) {
    %c0_i32 = arith.constant 0 : i32
    return %arg0, %arg1 : i32, i32
  }
}

</mosaic_0001>

<bundles_post_ra>
// kernel: tpu_custom_call.1
= control target key start
LH: loop header
LB: loop body
LE: loop exit
PB: predicated region body
PF: predicated region fallthrough
CT: control target
= control target key end

     0   :  { %8 = vsyncpa [#allocation4], 0  ;;  %s601_s0 = inlined_call_operand.hbm [shape: f32[16,128], index: 0, kind: input, shape index: {}]   ;;  %s602_s1 = inlined_call_operand.hbm [shape: f32[128,384], index: 1, kind: input, shape index: {}]   ;;  %s603_s2 = inlined_call_operand.vmem [shape: f32[1,384], index: 2, kind: input, shape index: {}]   ;;  %s604_s3 = inlined_call_operand.hbm [shape: f32[16,384], index: 3, kind: output, shape index: {}]  }
   0x1   :  { %9 = vsyncpa [#allocation7], 0 }
   0x2   :  { %10 = vsyncpa [#allocation5], 0  ;;  %s526_s12 = smov [#allocation3]   ;;  %s454_s16 = scalar_lea.hbm %s601_s0, 256 }
   0x3   :  { %s16_s13 = sshll.u32 %s526_s12, 4  ;;  %p455_p0 = scmp.ne.s32.totalorder %s601_s0, %s454_s16  ;;  %s17_s13 = int_to_ptr.vmem [resolvable:$true] %s16_s13 }
   0x4   :  { %p458_p1 = scmp.lt.u32.totalorder %s454_s16, %s601_s0 }
   0x6   :  { %p460_p2 = pnand %p458_p1, %p455_p0 }
   0x8   :  { %463 = shalt.err (!%p460_p2)
}
   0x9   :  { %s464_s21 = scalar_lea.vmem %s17_s13, 256  ;;  %p469_p4 = scmp.lt.s32.totalorder %s17_s13, %s17_s13 }
   0xa   :  { %p465_p3 = scmp.ne.s32.totalorder %s17_s13, %s464_s21  ;;  %p470_p5 = scmp.lt.s32.totalorder %s464_s21, %s464_s21 }
   0xc   :  { %p471_p6 = por %p470_p5, %p469_p4 }
   0xe   :  { %p472_p7 = pnand %p471_p6, %p465_p3 }
  0x10   :  { %475 = shalt.err (!%p472_p7)
}
  0x11   :  { %s527_s22 = smov 128   ;;  %s528_s23 = smov 8  }
  0x12   :  { %22 = dma.hbm_to_vmem [thread:$0]  %s601_s0, 256, %s17_s13, [#allocation4], %s527_s22, %s527_s22, %s528_s23  }
  0x13   :  { %s529_s26 = smov [#allocation6]   ;;  %s476_s30 = scalar_lea.hbm %s602_s1, 6144 }
  0x14   :  { %s28_s27 = sshll.u32 %s529_s26, 4  ;;  %p477_p8 = scmp.ne.s32.totalorder %s602_s1, %s476_s30  ;;  %s29_s27 = int_to_ptr.vmem [resolvable:$true] %s28_s27 }
  0x15   :  { %p480_p9 = scmp.lt.u32.totalorder %s476_s30, %s602_s1 }
  0x17   :  { %p482_p10 = pnand %p480_p9, %p477_p8 }
  0x19   :  { %485 = shalt.err (!%p482_p10)
}
  0x1a   :  { %s486_s8 = scalar_lea.vmem %s29_s27, 6144  ;;  %p491_p12 = scmp.lt.s32.totalorder %s29_s27, %s29_s27 }
  0x1b   :  { %p487_p11 = scmp.ne.s32.totalorder %s29_s27, %s486_s8  ;;  %p492_p13 = scmp.lt.s32.totalorder %s486_s8, %s486_s8 }
  0x1d   :  { %p493_p0 = por %p492_p13, %p491_p12 }
  0x1f   :  { %p494_p1 = pnand %p493_p0, %p487_p11 }
  0x21   :  { %497 = shalt.err (!%p494_p1)
}
  0x22   :  { %s530_s0 = smov 384   ;;  %s531_s9 = smov 24  }
  0x23   :  { %34 = dma.hbm_to_vmem [thread:$0]  %s602_s1, 6144, %s29_s27, [#allocation7], %s530_s0, %s530_s0, %s531_s9  }
  0x24   :  { %520 = dma.done.wait [#allocation4], 256  }
  0x25   :  { %521 = vsyncadd [#allocation4], 4294967040 }
  0x26   :  { %522 = dma.done.wait [#allocation7], 6144  }
  0x27   :  { %523 = vsyncadd [#allocation7], 4294961152  ;;  %v532_v0 = vmov 0.0   ;;  %v62_v1 = vld [vmem:[#allocation6 + $0x8] sm:$0xff]  ;;  %v65_v2 = vld [vmem:[#allocation6 + $0x20] sm:$0xff]  ;;  %s533_s13 = smov [#allocation8]  }
  0x28   :  { %173 = vmatprep.mubr.f32.mxu0 %v532_v0  ;;  %v61_v3 = vld [vmem:[#allocation6] sm:$0xff]  ;;  %v382_v4 = vpack.c.bf16 %v65_v2, %v62_v1  ;;  %v64_v5 = vld [vmem:[#allocation6 + $0x18] sm:$0xff]  ;;  %v63_v6 = vld [vmem:[#allocation6 + $0x10] sm:$0xff]  ;;  %s316_s14 = sshll.u32 %s533_s13, 4  ;;  %s317_s14 = int_to_ptr.vmem [resolvable:$true] %s316_s14 }
  0x29   :  { %v66_v7 = vld [vmem:[#allocation6 + $0x28] sm:$0xff]  ;;  %v384_v8 = vpack.c.bf16 %v64_v5, %v61_v3  ;;  %v68_v10 = vld [vmem:[#allocation6 + $0x38] sm:$0xff]  ;;  %v71_v11 = vld [vmem:[#allocation6 + $0x50] sm:$0xff]  ;;  %p503_p3 = scmp.lt.s32.totalorder %s317_s14, %s317_s14 }
  0x2a   :  { %v414_v9 = vpack.c.bf16 %v66_v7, %v63_v6  ;;  %v67_v12 = vld [vmem:[#allocation6 + $0x30] sm:$0xff]  ;;  %383 = vmatprep.subr.bf16.mxu0 %v382_v4  ;;  %v386_v13 = vpack.c.bf16 %v71_v11, %v68_v10  ;;  %v70_v14 = vld [vmem:[#allocation6 + $0x48] sm:$0xff]  ;;  %v69_v15 = vld [vmem:[#allocation6 + $0x40] sm:$0xff] }
  0x2b   :  { %v72_v16 = vld [vmem:[#allocation6 + $0x58] sm:$0xff]  ;;  %385 = vmatpush1.bf16.msra.mxu0 %v384_v8  ;;  %v388_v17 = vpack.c.bf16 %v70_v14, %v67_v12  ;;  %v74_v19 = vld [vmem:[#allocation6 + $0x68] sm:$0xff]  ;;  %v77_v20 = vld [vmem:[#allocation6 + $0x80] sm:$0xff]  ;;  %v284_v12 = vlaneseq }
  0x2c   :  { %415 = vmatprep.subr.bf16.mxu1 %v414_v9  ;;  %v418_v18 = vpack.c.bf16 %v72_v16, %v69_v15  ;;  %v73_v21 = vld [vmem:[#allocation6 + $0x60] sm:$0xff]  ;;  %387 = vmatprep.subr.bf16.mxu0 %v386_v13  ;;  %v390_v22 = vpack.c.bf16 %v77_v20, %v74_v19  ;;  %v76_v23 = vld [vmem:[#allocation6 + $0x78] sm:$0xff]  ;;  %v75_v24 = vld [vmem:[#allocation6 + $0x70] sm:$0xff] }
  0x2d   :  { %417 = vmatpush3.bf16.msra.mxu1 %v414_v9  ;;  %v78_v25 = vld [vmem:[#allocation6 + $0x88] sm:$0xff]  ;;  %v80_v27 = vld [vmem:[#allocation6 + $0x98] sm:$0xff]  ;;  %v83_v28 = vld [vmem:[#allocation6 + $0xb0] sm:$0xff]  ;;  %v392_v31 = vpack.c.bf16 %v76_v23, %v73_v21  ;;  %v285_v13 = vshrl.u32 %v284_v12, 7 }
  0x2e   :  { %419 = vmatprep.subr.bf16.mxu1 %v418_v18  ;;  %v422_v26 = vpack.c.bf16 %v78_v25, %v75_v24  ;;  %v81_v29 = vld [vmem:[#allocation6 + $0xa0] sm:$0xff]  ;;  %v84_v30 = vld [vmem:[#allocation6 + $0xb8] sm:$0xff]  ;;  %v394_v32 = vpack.c.bf16 %v83_v28, %v80_v27  ;;  %v79_v33 = vld [vmem:[#allocation6 + $0x90] sm:$0xff] }
  0x2f   :  { %389 = vmatpush1.bf16.msra.mxu0 %v388_v17  ;;  %v82_v34 = vld [vmem:[#allocation6 + $0xa8] sm:$0xff]  ;;  %v426_v35 = vpack.c.bf16 %v84_v30, %v81_v29  ;;  %v89_v37 = vld [vmem:[#allocation6 + $0xe0] sm:$0xff]  ;;  %v87_v38 = vld [vmem:[#allocation6 + $0xd0] sm:$0xff]  ;;  %v286_v14 = vsub.s32 0, %v285_v13  ;;  %v290_v16 = vsub.s32 1, %v285_v13  ;;  %v294_v17 = vsub.s32 2, %v285_v13 }
  0x30   :  { %391 = vmatprep.subr.bf16.mxu0 %v390_v22  ;;  %v86_v36 = vld [vmem:[#allocation6 + $0xc8] sm:$0xff]  ;;  %v396_v40 = vpack.c.bf16 %v82_v34, %v79_v33  ;;  %v85_v42 = vld [vmem:[#allocation6 + $0xc0] sm:$0xff]  ;;  %v88_v43 = vld [vmem:[#allocation6 + $0xd8] sm:$0xff] }
  0x31   :  { %421 = vmatpush3.bf16.msra.mxu1 %v418_v18  ;;  %v90_v39 = vld [vmem:[#allocation6 + $0xe8] sm:$0xff]  ;;  %v398_v41 = vpack.c.bf16 %v89_v37, %v86_v36  ;;  %v92_v45 = vld [vmem:[#allocation6 + $0xf8] sm:$0xff]  ;;  %v95_v46 = vld [vmem:[#allocation6 + $0x110] sm:$0xff]  ;;  %v400_v49 = vpack.c.bf16 %v88_v43, %v85_v42 }
  0x32   :  { %423 = vmatprep.subr.bf16.mxu1 %v422_v26  ;;  %v430_v44 = vpack.c.bf16 %v90_v39, %v87_v38  ;;  %v93_v47 = vld [vmem:[#allocation6 + $0x100] sm:$0xff]  ;;  %v96_v48 = vld [vmem:[#allocation6 + $0x118] sm:$0xff]  ;;  %v402_v50 = vpack.c.bf16 %v95_v46, %v92_v45  ;;  %v91_v51 = vld [vmem:[#allocation6 + $0xf0] sm:$0xff] }
  0x33   :  { %393 = vmatpush1.bf16.msra.mxu0 %v392_v31  ;;  %v94_v52 = vld [vmem:[#allocation6 + $0x108] sm:$0xff]  ;;  %v59_v53 = vld [vmem:[#allocation3] sm:$0xff]  ;;  %v434_v54 = vpack.c.bf16 %v96_v48, %v93_v47  ;;  %v101_v56 = vld [vmem:[#allocation6 + $0x140] sm:$0xff] }
  0x34   :  { %395 = vmatprep.subr.bf16.mxu0 %v394_v32  ;;  %v98_v55 = vld [vmem:[#allocation6 + $0x128] sm:$0xff]  ;;  %379 = vmatprep.mubr.f32.mxu1 %v59_v53  ;;  %v99_v57 = vld [vmem:[#allocation6 + $0x130] sm:$0xff]  ;;  %v404_v59 = vpack.c.bf16 %v94_v52, %v91_v51  ;;  %v97_v61 = vld [vmem:[#allocation6 + $0x120] sm:$0xff] }
  0x35   :  { %425 = vmatpush3.bf16.msra.mxu1 %v422_v26  ;;  %v102_v58 = vld [vmem:[#allocation6 + $0x148] sm:$0xff]  ;;  %v406_v60 = vpack.c.bf16 %v101_v56, %v98_v55  ;;  %v100_v62 = vld [vmem:[#allocation6 + $0x138] sm:$0xff]  ;;  %v107_v2 = vld [vmem:[#allocation6 + $0x170] sm:$0xff] }
  0x36   :  { %427 = vmatprep.subr.bf16.mxu1 %v426_v35  ;;  %v438_v63 = vpack.c.bf16 %v102_v58, %v99_v57  ;;  %v104_v1 = vld [vmem:[#allocation6 + $0x158] sm:$0xff]  ;;  %v105_v3 = vld [vmem:[#allocation6 + $0x160] sm:$0xff]  ;;  %v408_v5 = vpack.c.bf16 %v100_v62, %v97_v61  ;;  %v103_v7 = vld [vmem:[#allocation6 + $0x150] sm:$0xff] }
  0x37   :  { %397 = vmatpush1.bf16.msra.mxu0 %v396_v40  ;;  %v108_v4 = vld [vmem:[#allocation6 + $0x178] sm:$0xff]  ;;  %v410_v6 = vpack.c.bf16 %v107_v2, %v104_v1  ;;  %v106_v8 = vld [vmem:[#allocation6 + $0x168] sm:$0xff]  ;;  %v282_v15 = vld [vmem:[%s603_s2] sm:$0x7]  ;;  %s498_s2 = scalar_lea.vmem %s317_s14, 768 }
  0x38   :  { %399 = vmatprep.subr.bf16.mxu0 %v398_v41  ;;  %v442_v9 = vpack.c.bf16 %v108_v4, %v105_v3  ;;  %v412_v10 = vpack.c.bf16 %v106_v8, %v103_v7  ;;  %v60_v11 = vld [vmem:[#allocation3 + $0x8] sm:$0xff]  ;;  %v287_v18 = vrot.slane %v282_v15, %v286_v14  ;;  %v291_v19 = vrot.slane %v282_v15, %v290_v16  ;;  %p499_p2 = scmp.ne.s32.totalorder %s317_s14, %s498_s2  ;;  %p504_p4 = scmp.lt.s32.totalorder %s498_s2, %s498_s2 }
  0x39   :  { %429 = vmatpush3.bf16.msra.mxu1 %v426_v35  ;;  %v295_v20 = vrot.slane %v282_v15, %v294_v17 }
  0x3a   :  { %431 = vmatprep.subr.bf16.mxu1 %v430_v44  ;;  %p505_p5 = por %p504_p4, %p503_p3 }
  0x3b   :  { %401 = vmatpush1.bf16.msra.mxu0 %v400_v49 }
  0x3c   :  { %403 = vmatprep.subr.bf16.mxu0 %v402_v50  ;;  %p506_p6 = pnand %p505_p5, %p499_p2 }
  0x3d   :  { %433 = vmatpush3.bf16.msra.mxu1 %v430_v44 }
  0x3e   :  { %435 = vmatprep.subr.bf16.mxu1 %v434_v54 }
  0x3f   :  { %405 = vmatpush1.bf16.msra.mxu0 %v404_v59 }
  0x40   :  { %407 = vmatprep.subr.bf16.mxu0 %v406_v60 }
  0x41   :  { %437 = vmatpush3.bf16.msra.mxu1 %v434_v54 }
  0x42   :  { %439 = vmatprep.subr.bf16.mxu1 %v438_v63 }
  0x43   :  { %409 = vmatpush1.bf16.msra.mxu0 %v408_v5 }
  0x44   :  { %411 = vmatprep.subr.bf16.mxu0 %v410_v6 }
  0x45   :  { %441 = vmatpush3.bf16.msra.mxu1 %v438_v63 }
  0x46   :  { %443 = vmatprep.subr.bf16.mxu1 %v442_v9 }
  0x47   :  { %413 = vmatpush1.bf16.msra.mxu0 %v412_v10 }
  0x49   :  { %445 = vmatpush3.bf16.msra.mxu1 %v442_v9 }
  0x4a   :  { %174 = vmatmul.mubr.f32.vlgmr.msra.gmra.mrb[0].mxu0 %v59_v53 }
  0x4b   :  { %179 = vmatprep.mubr.f32.mxu0 %v532_v0 }
  0x4c   :  { %380 = vmatmul.mubr.f32.vlgmr.msra.gmra.mrb[0].mxu1 %v60_v11 }
  0x4e   :  { %180 = vmatmul.mubr.f32.gmra.mrb[2].mxu0 %v60_v11 }
 0x11d   :  { %v175_v21 = vpop.f32.mrb[0].mxu0 }
 0x11e   :  { %v299_v22 = vadd.f32 %v287_v18, %v175_v21  ;;  %v177_v23 = vpop.f32.mrb[1].mxu0 }
 0x11f   :  { %v381_v24 = vpop.f32.mrb[0].mxu1  ;;  %v300_v25 = vadd.f32 %v291_v19, %v177_v23 }
 0x120   :  { %v304_v0 = vadd.f32 %v381_v24, %v295_v20  ;;  %v252_v26 = vpop.f32.mrb[1].mxu1  ;;  %305 = vst [vmem:[#allocation8] sm:$0xff] %v299_v22 }
 0x121   :  { %v301_v27 = vadd.f32 %v295_v20, %v252_v26  ;;  %306 = vst [vmem:[#allocation8 + $0x8] sm:$0xff] %v300_v25  ;;  %v181_v28 = vpop.f32.mrb[2].mxu0 }
 0x122   :  { %310 = vst [vmem:[#allocation8 + $0x28] sm:$0xff] %v304_v0  ;;  %v302_v29 = vadd.f32 %v287_v18, %v181_v28  ;;  %v183_v30 = vpop.f32.mrb[3].mxu0 }
 0x123   :  { %307 = vst [vmem:[#allocation8 + $0x10] sm:$0xff] %v301_v27  ;;  %v303_v31 = vadd.f32 %v291_v19, %v183_v30 }
 0x124   :  { %308 = vst [vmem:[#allocation8 + $0x18] sm:$0xff] %v302_v29 }
 0x125   :  { %309 = vst [vmem:[#allocation8 + $0x20] sm:$0xff] %v303_v31 }
 0x126   :  { %509 = shalt.err (!%p506_p6)
}
 0x127   :  { %s510_s17 = scalar_lea.hbm %s604_s3, 768 }
 0x128   :  { %p511_p7 = scmp.ne.s32.totalorder %s604_s3, %s510_s17  ;;  %p514_p8 = scmp.lt.u32.totalorder %s510_s17, %s604_s3 }
 0x12a   :  { %p516_p9 = pnand %p514_p8, %p511_p7 }
 0x12c   :  { %519 = shalt.err (!%p516_p9)
}
 0x12d   :  { %322 = dma.vmem_to_hbm [thread:$0]  %s317_s14, 768, %s604_s3, [#allocation5], %s530_s0, %s530_s0, %s531_s9  }
 0x12e   :  { %524 = dma.done.wait [#allocation5], 768  }
 0x12f   :  { %525 = vsyncadd [#allocation5], 4294966528 }
 0x130   :  { %326 = vsyncpa [#allocation4], 1 }
 0x131   :  { %327 = vsyncpa [#allocation7], 1 }
 0x132   :  { %328 = vsyncpa [#allocation5], 1 }

</bundles_post_ra>
